<compile_context>
chip_gen: v7x
topology: tpu7x:2x2x1
jax: 0.10.0
libtpu: 0.0.40
codegen_flags: <defaults>
</compile_context>

<pallas_src>
import jax
import jax.numpy as jnp
from jax.experimental import pallas as pl
from jax.experimental.pallas import tpu as pltpu  # noqa: F401  (kept for TPU memory-space symbols if needed)

P_DROP = 0.5  # F.dropout default
_SCALE_KEEP = 1.0 / (1.0 - P_DROP)  # 2.0


def _dropout_cat_kernel(x_ref, u_ref, o_ref):
    # x_ref: VMEM (N, HW)  float32   -- flattened input
    # u_ref: VMEM (2N, HW) float32   -- uniform randoms in [0, 1)
    # o_ref: VMEM (2N, HW) float32   -- flattened output (x4)
    n = x_ref.shape[0]

    x1 = 1.0 - x_ref[...]                       # (N, HW)
    keep = u_ref[...] >= jnp.float32(P_DROP)    # (2N, HW), P(keep) = 1 - p

    # first half: dropout(x1 * 2)  -> x1 * (2 / (1-p)) where kept
    o_ref[0:n, :] = jnp.where(
        keep[0:n, :], x1 * jnp.float32(2.0 * _SCALE_KEEP), jnp.float32(0.0)
    )
    # second half: dropout(x1)     -> x1 * (1 / (1-p)) where kept
    o_ref[n:2 * n, :] = jnp.where(
        keep[n:2 * n, :], x1 * jnp.float32(_SCALE_KEEP), jnp.float32(0.0)
    )


def model_forward(input_tensor: jax.Array, rng_key: jax.Array) -> jax.Array:
    """Pallas equivalent of Model.forward (returns x4, shape (2N, H, W))."""
    n, h, w = input_tensor.shape
    hw = h * w

    # Lane-dense 2D views (last dim = H*W).
    x2d = input_tensor.reshape(n, hw).astype(jnp.float32)
    u2d = jax.random.uniform(rng_key, (2 * n, hw), dtype=jnp.float32)

    out2d = pl.pallas_call(
        _dropout_cat_kernel,
        out_shape=jax.ShapeDtypeStruct((2 * n, hw), jnp.float32),
        in_specs=[
            pl.BlockSpec((n, hw), lambda: (0, 0)),
            pl.BlockSpec((2 * n, hw), lambda: (0, 0)),
        ],
        out_specs=pl.BlockSpec((2 * n, hw), lambda: (0, 0)),
    )(x2d, u2d)

    return out2d.reshape(2 * n, h, w)


if __name__ == "__main__":
    key = jax.random.PRNGKey(0)
    k_in, k_drop = jax.random.split(key)

    # shape implied by the module: x1 = torch.randn(1, 2, 2)
    x = jax.random.normal(k_in, (1, 2, 2), dtype=jnp.float32)

    out = model_forward(x, k_drop)
    out = jax.block_until_ready(out)

    # sanity: output shape (2, 2, 2); kept elements equal x3 * 1/(1-p)
    assert out.shape == (2, 2, 2)
    x1 = 1.0 - x
    x3 = jnp.concatenate([x1 * 2.0, x1], axis=0)
    nz = out != 0.0
    assert bool(
        jnp.all(jnp.where(nz, jnp.isclose(out, x3 * _SCALE_KEEP, atol=1e-5), True))
    )

    print("KERNEL_OK")
</pallas_src>

<mosaic_0001>
module attributes {stable_mosaic.version = 11 : i64} {
  func.func @_dropout_cat_kernel(%arg0: memref<1x4xf32, #tpu.memory_space<vmem>>, %arg1: memref<2x4xf32, #tpu.memory_space<vmem>>, %arg2: memref<2x4xf32, #tpu.memory_space<vmem>>) attributes {dimension_semantics = [], scalar_prefetch = 0 : i64, scratch_operands = 0 : i64, tpu.core_type = #tpu.core_type<tc>} {
    %c0 = arith.constant 0 : index
    %c0_0 = arith.constant 0 : index
    %0 = vector.load %arg0[%c0, %c0_0] : memref<1x4xf32, #tpu.memory_space<vmem>>, vector<1x4xf32>
    %cst = arith.constant 1.000000e+00 : f32
    %1 = vector.broadcast %cst : f32 to vector<1x4xf32>
    %2 = arith.subf %1, %0 : vector<1x4xf32>
    %c0_1 = arith.constant 0 : index
    %c0_2 = arith.constant 0 : index
    %3 = vector.load %arg1[%c0_1, %c0_2] : memref<2x4xf32, #tpu.memory_space<vmem>>, vector<2x4xf32>
    %cst_3 = arith.constant 5.000000e-01 : f32
    %4 = vector.broadcast %cst_3 : f32 to vector<2x4xf32>
    %5 = arith.cmpf oge, %3, %4 : vector<2x4xf32>
    %6 = vector.extract_strided_slice %5 {offsets = [0, 0], sizes = [1, 4], strides = [1, 1]} : vector<2x4xi1> to vector<1x4xi1>
    %cst_4 = arith.constant 4.000000e+00 : f32
    %7 = vector.broadcast %cst_4 : f32 to vector<1x4xf32>
    %8 = arith.mulf %2, %7 : vector<1x4xf32>
    %cst_5 = arith.constant 0.000000e+00 : f32
    %9 = vector.broadcast %cst_5 : f32 to vector<1x4xf32>
    %10 = arith.select %6, %8, %9 : vector<1x4xi1>, vector<1x4xf32>
    %c0_6 = arith.constant 0 : index
    %c0_7 = arith.constant 0 : index
    %11 = vector.load %arg2[%c0_6, %c0_7] : memref<2x4xf32, #tpu.memory_space<vmem>>, vector<1x4xf32>
    tpu.vector_store %arg2[%c0_6, %c0_7], %10 {strides = array<i32>} : memref<2x4xf32, #tpu.memory_space<vmem>>, vector<1x4xf32>,
    %12 = vector.extract_strided_slice %5 {offsets = [1, 0], sizes = [1, 4], strides = [1, 1]} : vector<2x4xi1> to vector<1x4xi1>
    %cst_8 = arith.constant 2.000000e+00 : f32
    %13 = vector.broadcast %cst_8 : f32 to vector<1x4xf32>
    %14 = arith.mulf %2, %13 : vector<1x4xf32>
    %cst_9 = arith.constant 0.000000e+00 : f32
    %15 = vector.broadcast %cst_9 : f32 to vector<1x4xf32>
    %16 = arith.select %12, %14, %15 : vector<1x4xi1>, vector<1x4xf32>
    %c1 = arith.constant 1 : index
    %c0_10 = arith.constant 0 : index
    %17 = vector.load %arg2[%c1, %c0_10] : memref<2x4xf32, #tpu.memory_space<vmem>>, vector<1x4xf32>
    tpu.vector_store %arg2[%c1, %c0_10], %16 {strides = array<i32>} : memref<2x4xf32, #tpu.memory_space<vmem>>, vector<1x4xf32>,
    return
  }
}

</mosaic_0001>

<bundles_post_ra>
// kernel: tpu_custom_call.1
= control target key start
LH: loop header
LB: loop body
LE: loop exit
PB: predicated region body
PF: predicated region fallthrough
CT: control target
= control target key end

     0   :  { %7 = vsyncpa [#allocation3], 0  ;;  %s151_s0 = inlined_call_operand.hbm [shape: f32[1,4], index: 0, kind: input, shape index: {}]   ;;  %s152_s1 = inlined_call_operand.vmem [shape: f32[2,4], index: 1, kind: input, shape index: {}]   ;;  %s153_s2 = inlined_call_operand.hbm [shape: f32[2,4], index: 2, kind: output, shape index: {}]  }
   0x1   :  { %8 = vsyncpa [#allocation4], 0  ;;  %s107_s9 = smov [#allocation2]   ;;  %s59_s13 = scalar_lea.hbm %s151_s0, 16 }
   0x2   :  { %s15_s10 = sshll.u32 %s107_s9, 4  ;;  %p60_p0 = scmp.ne.s32.totalorder %s151_s0, %s59_s13  ;;  %s16_s10 = int_to_ptr.vmem [resolvable:$true] %s15_s10 }
   0x3   :  { %p63_p1 = scmp.lt.u32.totalorder %s59_s13, %s151_s0 }
   0x5   :  { %p65_p2 = pnand %p63_p1, %p60_p0 }
   0x7   :  { %68 = shalt.err (!%p65_p2)
}
   0x8   :  { %s69_s18 = scalar_lea.vmem %s16_s10, 16  ;;  %s73_s19 = scalar_lea.vmem %s16_s10, 32 }
   0x9   :  { %p70_p3 = scmp.ne.s32.totalorder %s16_s10, %s69_s18  ;;  %p74_p4 = scmp.lt.s32.totalorder %s16_s10, %s16_s10 }
   0xa   :  { %p75_p5 = scmp.lt.s32.totalorder %s73_s19, %s69_s18 }
   0xc   :  { %p76_p6 = por %p75_p5, %p74_p4 }
   0xe   :  { %p77_p7 = pnand %p76_p6, %p70_p3 }
  0x10   :  { %80 = shalt.err (!%p77_p7)
}
  0x11   :  { %18 = dma.hbm_to_vmem [thread:$0]  %s151_s0, 16, %s16_s10, [#allocation3]  }
  0x12   :  { %103 = dma.done.wait [#allocation3], 16  }
  0x13   :  { %104 = vsyncadd [#allocation3], 4294967280  ;;  %v34_v0 = vlaneseq  ;;  %v24_v2 = vld [vmem:[#allocation2] sm:$0x1]  ;;  %v26_v3 = vld [vmem:[%s152_s1] sm:$0x3] }
  0x14   :  { %v25_v4 = vsub.f32 1.0, %v24_v2  ;;  %vm27_vm0 = vcmp.ge.f32.partialorder %v26_v3, 0.5  ;;  %vm30_vm1 = vcmask 24576   ;;  %s108_s24 = smov [#allocation5]   ;;  %vm40_vm2 = vcmask 25601  }
  0x15   :  { %v35_v1 = vshrl.u32 %v34_v0, 7  ;;  %s48_s25 = sshll.u32 %s108_s24, 4  ;;  %s49_s25 = int_to_ptr.vmem [resolvable:$true] %s48_s25 }
  0x16   :  { %v28_v6 = vmul.f32 4.0, %v25_v4  ;;  %v32_v7 = vmul.f32 2.0, %v25_v4  ;;  %s81_s0 = scalar_lea.vmem %s49_s25, 32  ;;  %p86_p9 = scmp.lt.s32.totalorder %s49_s25, %s49_s25 }
  0x17   :  { %v36_v5 = vsub.s32 0, %v35_v1  ;;  %p82_p8 = scmp.ne.s32.totalorder %s49_s25, %s81_s0  ;;  %p87_p10 = scmp.lt.s32.totalorder %s81_s0, %s81_s0 }
  0x18   :  { %v29_v8 = vsel %vm27_vm0, %v28_v6, 0.0 }
  0x19   :  { %v37_v9 = vrot.slane %v32_v7, %v36_v5  ;;  %31 = vst.msk [vmem:[#allocation5] sm:$0x1] %vm30_vm1, %v29_v8  ;;  %p88_p11 = por %p87_p10, %p86_p9 }
  0x1b   :  { %v39_v10 = vsel %vm27_vm0, %v37_v9, 0.0  ;;  %p89_p12 = pnand %p88_p11, %p82_p8 }
  0x1c   :  { %41 = vst.msk [vmem:[#allocation5] sm:$0x2] %vm40_vm2, %v39_v10 }
  0x1d   :  { %92 = shalt.err (!%p89_p12)
}
  0x1e   :  { %s93_s27 = scalar_lea.hbm %s153_s2, 32 }
  0x1f   :  { %p94_p13 = scmp.ne.s32.totalorder %s153_s2, %s93_s27  ;;  %p97_p0 = scmp.lt.u32.totalorder %s93_s27, %s153_s2 }
  0x21   :  { %p99_p1 = pnand %p97_p0, %p94_p13 }
  0x23   :  { %102 = shalt.err (!%p99_p1)
}
  0x24   :  { %51 = dma.vmem_to_hbm [thread:$0]  %s49_s25, 32, %s153_s2, [#allocation4]  }
  0x25   :  { %105 = dma.done.wait [#allocation4], 32  }
  0x26   :  { %106 = vsyncadd [#allocation4], 4294967264 }
  0x27   :  { %55 = vsyncpa [#allocation3], 1 }
  0x28   :  { %56 = vsyncpa [#allocation4], 1 }

</bundles_post_ra>
